<compile_context>
chip_gen: v7x
topology: tpu7x:2x2x1
jax: 0.10.0
libtpu: 0.0.40
codegen_flags: <defaults>
</compile_context>

<pallas_src>
import functools
import math

import jax
import jax.numpy as jnp
from jax import lax
from jax.experimental import pallas as pl
from jax.experimental.pallas import tpu as pltpu

IGNORE_INDEX = -100

# Target cap on native-dtype logits bytes streamed per grid step.
_MAX_TILE_BYTES = 8 * 1024 * 1024


def _ce_mask_kernel(class_axis, class_grid_axis, n_class_blocks, class_tile,
                    num_classes, ignore_index, *refs):
    """One tile of the masked-CE numerator.

    class_axis == 0: logits tile is (TC, TR)  (classes on sublanes, rows on lanes)
    class_axis == 1: logits tile is (TR, TC)  (rows on sublanes, classes on lanes)
    target/mask tiles carry a 1 on the class axis.  Each row-block grid point
    writes its own partial numerator sum (no serial output accumulator).  When
    n_class_blocks > 1 an online (flash-style) logsumexp runs across the class
    chunk axis using tiny per-row scratch.
    """
    if n_class_blocks > 1:
        logits_ref, tgt_ref, mask_ref, out_ref, m_ref, s_ref, p_ref = refs
    else:
        logits_ref, tgt_ref, mask_ref, out_ref = refs

    logits = logits_ref[...].astype(jnp.float32)
    tgt = tgt_ref[...]                                    # int32, 1 on class axis

    # Small class-id vector along the class axis only; the broadcast against
    # `tgt` happens inside the compare (no full-tile int32 temporary).
    cid_shape = (logits.shape[0], 1) if class_axis == 0 else (1, logits.shape[1])
    cls_ids = lax.broadcasted_iota(jnp.int32, cid_shape, class_axis)
    if n_class_blocks > 1:
        cls_ids = cls_ids + pl.program_id(class_grid_axis) * class_tile

    # Ragged class tail (only possible when class-chunked): the last chunk
    # reads past C; neutralize those classes so they contribute nothing to the
    # max / sum-exp.
    if n_class_blocks * class_tile != num_classes:
        logits = jnp.where(cls_ids < num_classes, logits, -jnp.inf)

    onehot = cls_ids == tgt                               # broadcast compare
    chunk_max = jnp.max(logits, axis=class_axis, keepdims=True)
    valid = tgt != ignore_index

    if n_class_blocks == 1:
        # ---- Single pass over the whole class axis. ----
        shifted = logits - chunk_max
        sum_exp = jnp.sum(jnp.exp(shifted), axis=class_axis, keepdims=True)
        picked = jnp.sum(jnp.where(onehot, shifted, 0.0),
                         axis=class_axis, keepdims=True)
        # Rows past the true row count carry target=ignore_index and mask=0,
        # which zero out any garbage read out-of-bounds by the last row block.
        per_elem = jnp.where(valid, jnp.log(sum_exp) - picked, 0.0)
        mask = mask_ref[...].astype(jnp.float32)
        out_ref[...] = jnp.sum(per_elem * mask, keepdims=True)
        return

    # ---- Online logsumexp across class chunks (class grid axis is last). ----
    c_blk = pl.program_id(class_grid_axis)

    @pl.when(c_blk == 0)
    def _init():
        m_ref[...] = jnp.full(m_ref.shape, -jnp.inf, jnp.float32)
        s_ref[...] = jnp.zeros(s_ref.shape, jnp.float32)
        p_ref[...] = jnp.zeros(p_ref.shape, jnp.float32)

    picked_c = jnp.sum(jnp.where(onehot, logits, 0.0),
                       axis=class_axis, keepdims=True)    # raw logit at target
    m_old = m_ref[...]
    m_new = jnp.maximum(m_old, chunk_max)
    s_ref[...] = (s_ref[...] * jnp.exp(m_old - m_new)
                  + jnp.sum(jnp.exp(logits - m_new),
                            axis=class_axis, keepdims=True))
    p_ref[...] = p_ref[...] + picked_c
    m_ref[...] = m_new

    @pl.when(c_blk == n_class_blocks - 1)
    def _finalize():
        mask = mask_ref[...].astype(jnp.float32)
        lse = m_ref[...] + jnp.log(s_ref[...])
        per_elem = jnp.where(valid, lse - p_ref[...], 0.0)
        out_ref[...] = jnp.sum(per_elem * mask, keepdims=True)


def _vmem_limit_bytes():
    """Scoped-VMEM limit derived from the physical capacity (with headroom)."""
    phys = None
    try:
        info = pltpu.get_tpu_info()
        phys = getattr(info, "vmem_capacity_bytes", None)
    except Exception:
        phys = None
    if not phys:
        phys = 64 * 1024 * 1024          # conservative (v7x-sized) fallback
    return int(min(phys * 3 // 4, 100 * 1024 * 1024))


def _pick_tiles(total_rows, num_classes, itemsize, budget_bytes,
                row_quantum, class_quantum, row_tile=None, class_tile=None):
    """Pick (row_tile, n_row_blocks, class_tile, n_class_blocks).

    Honest per-element accounting: double-buffered native logits tile plus the
    f32 working set (upcast / shifted / exp / one-hot select).  If even a
    row-quantum tile over the full class axis does not fit, tile the class
    axis instead of silently overshooting the VMEM limit.
    """
    per_elem = 2 * itemsize + 24
    max_elems = max(budget_bytes // per_elem, row_quantum * class_quantum)
    max_elems = min(max_elems, max(_MAX_TILE_BYTES // itemsize,
                                   row_quantum * class_quantum))

    if class_tile is not None:
        tc = min(int(class_tile), num_classes)
    elif num_classes * row_quantum <= max_elems or num_classes <= class_quantum:
        tc = num_classes
    else:
        tc = (max_elems // row_quantum // class_quantum) * class_quantum
        tc = min(max(tc, class_quantum), num_classes)
    n_cb = pl.cdiv(num_classes, tc)

    if row_tile is not None:
        tr = min(int(row_tile), total_rows)
    else:
        tr = max((max_elems // tc) // row_quantum * row_quantum, row_quantum)
        if total_rows <= tr:
            tr = total_rows
    n_rb = pl.cdiv(total_rows, tr)
    return tr, n_rb, tc, n_cb


def _xla_masked_ce_sum(logits_last, tgt, mk, ignore_index):
    """Numerator via plain XLA (logits channels-last). Used for tiny-C 2D inputs."""
    lg = logits_last.astype(jnp.float32)
    lse = jax.scipy.special.logsumexp(lg, axis=-1)
    safe = jnp.where(tgt == ignore_index, 0, tgt)
    picked = jnp.take_along_axis(lg, safe[..., None], axis=-1)[..., 0]
    per = jnp.where(tgt == ignore_index, 0.0, lse - picked)
    return jnp.sum(per * mk)


def cross_entropy_loss_with_mask(logits, target, mask, weight=None,
                                 ignore_index=IGNORE_INDEX,
                                 row_tile=None, class_tile=None):
    """logits: (B, C, d1..dk); target: (B, d1..dk) int; mask broadcastable with
    target.  Returns the scalar masked-mean cross entropy."""
    B, C = logits.shape[0], logits.shape[1]
    spatial = tuple(logits.shape[2:])
    tgt_shape = (B,) + spatial

    tg = jnp.broadcast_to(target, tgt_shape).astype(jnp.int32)
    mk = jnp.broadcast_to(mask, tgt_shape).astype(jnp.float32)

    if weight is not None:
        # Hoisted out of the kernel: weight[target] only touches the tiny
        # target array.  Ignored targets are clamped to class 0 (PyTorch's
        # weight[target] assumes valid targets when weight is used).
        w = jnp.asarray(weight, jnp.float32)
        mk = mk * w[jnp.where(tg == ignore_index, 0, tg)]

    # Denominator depends only on the (tiny, weighted) mask: plain JAX.
    denom = jnp.sum(mk)

    itemsize = jnp.dtype(logits.dtype).itemsize
    sublane_quantum = 32 // min(itemsize, 4)      # 8 f32 / 16 bf16 / 32 int8
    vmem_limit = _vmem_limit_bytes()
    budget = max(vmem_limit - 4 * 1024 * 1024, 8 * 1024 * 1024)

    if spatial:
        # ---- Spatial path: consume (B, C, S) directly (no transpose pass);
        # classes on sublanes, rows/pixels on lanes. ----
        S = math.prod(spatial)
        lg = logits.reshape(B, C, S)               # free reshape, native dtype
        tr, n_rb, tc, n_cb = _pick_tiles(
            S, C, itemsize, budget,
            row_quantum=128, class_quantum=sublane_quantum,
            row_tile=row_tile, class_tile=class_tile)
        s_pad = n_rb * tr
        tg2 = tg.reshape(B, 1, S)
        mk2 = mk.reshape(B, 1, S)
        if s_pad != S:
            # Only the tiny per-row arrays are padded; padded lanes carry
            # target=ignore_index and mask=0, neutralizing the (undefined)
            # out-of-bounds logits lanes read by the last row block.
            tg2 = jnp.pad(tg2, ((0, 0), (0, 0), (0, s_pad - S)),
                          constant_values=ignore_index)
            mk2 = jnp.pad(mk2, ((0, 0), (0, 0), (0, s_pad - S)))

        grid = (B, n_rb, n_cb)
        # NOTE: if profiling shows exposed DMA (C strided rows per tile), add
        # pipeline_mode=pl.Buffered(3) to the logits BlockSpec below.
        in_specs = [
            pl.BlockSpec((None, tc, tr), lambda b, r, c: (b, c, r)),
            pl.BlockSpec((None, 1, tr), lambda b, r, c: (b, 0, r)),
            pl.BlockSpec((None, 1, tr), lambda b, r, c: (b, 0, r)),
        ]
        args = [lg, tg2, mk2]
        n_part = B * n_rb
        out_specs = pl.BlockSpec((None, 1, 1),
                                 lambda b, r, c: (b * n_rb + r, 0, 0))
        out_shape = jax.ShapeDtypeStruct((n_part, 1, 1), jnp.float32)
        scratch_shapes = ()
        if n_cb > 1:
            scratch_shapes = tuple(pltpu.VMEM((1, tr), jnp.float32)
                                   for _ in range(3))
        kernel = functools.partial(_ce_mask_kernel, 0, 2, n_cb, tc, C,
                                   ignore_index)
        dims = ("parallel", "parallel", "arbitrary")
    else:
        # ---- 2D path: (N, C) rows on sublanes, classes on lanes. ----
        N = B
        if C < 128 and row_tile is None and class_tile is None:
            # Lanes would be <10% used and the input is tiny: plain XLA wins.
            return _xla_masked_ce_sum(logits, tg, mk, ignore_index) / denom
        lg = logits                                  # (N, C), native dtype
        tr, n_rb, tc, n_cb = _pick_tiles(
            N, C, itemsize, budget,
            row_quantum=sublane_quantum, class_quantum=128,
            row_tile=row_tile, class_tile=class_tile)
        n_pad = n_rb * tr
        tg2 = tg.reshape(N, 1)
        mk2 = mk.reshape(N, 1)
        if n_pad != N:
            tg2 = jnp.pad(tg2, ((0, n_pad - N), (0, 0)),
                          constant_values=ignore_index)
            mk2 = jnp.pad(mk2, ((0, n_pad - N), (0, 0)))

        grid = (n_rb, n_cb)
        in_specs = [
            pl.BlockSpec((tr, tc), lambda r, c: (r, c)),
            pl.BlockSpec((tr, 1), lambda r, c: (r, 0)),
            pl.BlockSpec((tr, 1), lambda r, c: (r, 0)),
        ]
        args = [lg, tg2, mk2]
        out_specs = pl.BlockSpec((None, 1, 1), lambda r, c: (r, 0, 0))
        out_shape = jax.ShapeDtypeStruct((n_rb, 1, 1), jnp.float32)
        scratch_shapes = ()
        if n_cb > 1:
            scratch_shapes = tuple(pltpu.VMEM((tr, 1), jnp.float32)
                                   for _ in range(3))
        kernel = functools.partial(_ce_mask_kernel, 1, 1, n_cb, tc, C,
                                   ignore_index)
        dims = ("parallel", "arbitrary")

    partials = pl.pallas_call(
        kernel,
        grid=grid,
        in_specs=in_specs,
        out_specs=out_specs,
        out_shape=out_shape,
        scratch_shapes=scratch_shapes,
        compiler_params=pltpu.CompilerParams(
            dimension_semantics=dims,
            vmem_limit_bytes=vmem_limit),
    )(*args)

    # Glue: sum the tiny per-block numerator partials and divide by mask.sum().
    return jnp.sum(partials) / denom


def _ref_loss(logits, target, mask, weight=None, ignore_index=IGNORE_INDEX):
    """Pure-JAX reference matching the PyTorch forward."""
    lg = jnp.moveaxis(logits, 1, -1).astype(jnp.float32)
    lse = jax.scipy.special.logsumexp(lg, axis=-1)
    safe_t = jnp.where(target == ignore_index, 0, target)
    picked = jnp.take_along_axis(lg, safe_t[..., None], axis=-1)[..., 0]
    per = jnp.where(target == ignore_index, 0.0, lse - picked)
    m = jnp.broadcast_to(mask, target.shape).astype(jnp.float32)
    if weight is not None:
        m = m * weight[safe_t]
    return (per * m).sum() / m.sum()


if __name__ == "__main__":
    key = jax.random.PRNGKey(0)
    keys = jax.random.split(key, 12)

    # --- 4D spatial case (primary module use): logits (B, C, H, W). ----------
    B, C, H, W = 2, 8, 8, 8
    logits = jax.random.normal(keys[0], (B, C, H, W), dtype=jnp.float32)
    target = jax.random.randint(keys[1], (B, H, W), 0, C)
    ignore = jax.random.bernoulli(keys[2], 0.1, (B, H, W))
    target = jnp.where(ignore, IGNORE_INDEX, target).astype(jnp.int32)
    mask = jax.random.bernoulli(keys[3], 0.7, (B, H, W)).astype(jnp.float32)

    loss = jax.block_until_ready(cross_entropy_loss_with_mask(logits, target, mask))
    expected = _ref_loss(logits, target, mask)
    assert jnp.allclose(loss, expected, rtol=1e-4, atol=1e-4), (loss, expected)

    # Weighted variant (weight[target] folded into the mask wrapper-side).
    weight = jnp.linspace(0.5, 1.5, C, dtype=jnp.float32)
    loss_w = jax.block_until_ready(
        cross_entropy_loss_with_mask(logits, target, mask, weight=weight))
    expected_w = _ref_loss(logits, target, mask, weight=weight)
    assert jnp.allclose(loss_w, expected_w, rtol=1e-4, atol=1e-4), (loss_w, expected_w)

    # bf16 logits stream in native dtype (kernel upcasts per tile).
    logits_bf16 = logits.astype(jnp.bfloat16)
    loss_bf = jax.block_until_ready(
        cross_entropy_loss_with_mask(logits_bf16, target, mask))
    expected_bf = _ref_loss(logits_bf16.astype(jnp.float32), target, mask)
    assert jnp.allclose(loss_bf, expected_bf, rtol=1e-4, atol=1e-4), (loss_bf, expected_bf)

    # --- Spatial case exercising ragged row tail + class-chunked online lse. -
    B2, C2, H2, W2 = 1, 20, 8, 20                 # S=160 -> 2 row blocks of 128
    logits_s = jax.random.normal(keys[4], (B2, C2, H2, W2), dtype=jnp.float32)
    target_s = jax.random.randint(keys[5], (B2, H2, W2), 0, C2).astype(jnp.int32)
    mask_s = jax.random.bernoulli(keys[6], 0.8, (B2, H2, W2)).astype(jnp.float32)
    loss_s = jax.block_until_ready(
        cross_entropy_loss_with_mask(logits_s, target_s, mask_s,
                                     row_tile=128, class_tile=8))
    expected_s = _ref_loss(logits_s, target_s, mask_s)
    assert jnp.allclose(loss_s, expected_s, rtol=1e-4, atol=1e-4), (loss_s, expected_s)

    # --- 2D case, C >= 128: Pallas path with forced class chunking + row pad. -
    N3, C3 = 50, 200
    logits3 = jax.random.normal(keys[7], (N3, C3), dtype=jnp.float32)
    target3 = jax.random.randint(keys[8], (N3,), 0, C3)
    ignore3 = jax.random.bernoulli(keys[9], 0.2, (N3,))
    target3 = jnp.where(ignore3, IGNORE_INDEX, target3).astype(jnp.int32)
    mask3 = jax.random.bernoulli(keys[10], 0.6, (N3,)).astype(jnp.float32)
    loss3 = jax.block_until_ready(
        cross_entropy_loss_with_mask(logits3, target3, mask3,
                                     row_tile=32, class_tile=128))
    expected3 = _ref_loss(logits3, target3, mask3)
    assert jnp.allclose(loss3, expected3, rtol=1e-4, atol=1e-4), (loss3, expected3)

    # --- 2D case with tiny C: dispatches to the plain-XLA path by design. ----
    N4, C4 = 16, 8
    logits4 = jax.random.normal(keys[11], (N4, C4), dtype=jnp.float32)
    target4 = jax.random.randint(jax.random.PRNGKey(1), (N4,), 0, C4).astype(jnp.int32)
    mask4 = jax.random.bernoulli(jax.random.PRNGKey(2), 0.6, (N4,)).astype(jnp.float32)
    loss4 = jax.block_until_ready(
        cross_entropy_loss_with_mask(logits4, target4, mask4))
    expected4 = _ref_loss(logits4, target4, mask4)
    assert jnp.allclose(loss4, expected4, rtol=1e-4, atol=1e-4), (loss4, expected4)

    print("KERNEL_OK")
</pallas_src>

<mosaic_0001>
module attributes {stable_mosaic.version = 11 : i64} {
  func.func @_ce_mask_kernel(%arg0: i32, %arg1: i32, %arg2: i32, %arg3: memref<1x8x64xf32, #tpu.memory_space<vmem>>, %arg4: memref<1x1x64xi32, #tpu.memory_space<vmem>>, %arg5: memref<1x1x64xf32, #tpu.memory_space<vmem>>, %arg6: memref<1x1x1xf32, #tpu.memory_space<vmem>>) attributes {dimension_semantics = [#tpu.dimension_semantics<parallel>, #tpu.dimension_semantics<parallel>, #tpu.dimension_semantics<arbitrary>], iteration_bounds = array<i64: 2, 1, 1>, scalar_prefetch = 0 : i64, scratch_operands = 0 : i64, tpu.core_type = #tpu.core_type<tc>, window_params = [{transform_indices = @transform_0, window_bounds = array<i64: 1, 8, 64>}, {transform_indices = @transform_1, window_bounds = array<i64: 1, 1, 64>}, {transform_indices = @transform_2, window_bounds = array<i64: 1, 1, 64>}, {transform_indices = @transform_3, window_bounds = array<i64: 1, 1, 1>}]} {
    %c0 = arith.constant 0 : index
    %c0_0 = arith.constant 0 : index
    %c0_1 = arith.constant 0 : index
    %0 = vector.load %arg3[%c0, %c0_0, %c0_1] : memref<1x8x64xf32, #tpu.memory_space<vmem>>, vector<1x8x64xf32>
    %1 = vector.shape_cast %0 : vector<1x8x64xf32> to vector<8x64xf32>
    %c0_2 = arith.constant 0 : index
    %c0_3 = arith.constant 0 : index
    %c0_4 = arith.constant 0 : index
    %2 = vector.load %arg4[%c0_2, %c0_3, %c0_4] : memref<1x1x64xi32, #tpu.memory_space<vmem>>, vector<1x1x64xi32>
    %3 = vector.shape_cast %2 : vector<1x1x64xi32> to vector<1x64xi32>
    %4 = tpu.iota {dimensions = array<i32: 0>} : vector<8x1xi32>
    %5 = vector.broadcast %4 : vector<8x1xi32> to vector<8x64xi32>
    %6 = vector.broadcast %3 : vector<1x64xi32> to vector<8x64xi32>
    %7 = arith.cmpi eq, %5, %6 : vector<8x64xi32>
    %cst = arith.constant dense<0xFF800000> : vector<64xf32>
    %8 = vector.multi_reduction <maximumf>, %1, %cst [0] : vector<8x64xf32> to vector<64xf32>
    %9 = vector.shape_cast %8 : vector<64xf32> to vector<1x64xf32>
    %c-100_i32 = arith.constant -100 : i32
    %10 = vector.broadcast %c-100_i32 : i32 to vector<1x64xi32>
    %11 = arith.cmpi ne, %3, %10 : vector<1x64xi32>
    %12 = vector.broadcast %9 : vector<1x64xf32> to vector<8x64xf32>
    %13 = arith.subf %1, %12 : vector<8x64xf32>
    %14 = math.exp %13 : vector<8x64xf32>
    %cst_5 = arith.constant dense<0.000000e+00> : vector<64xf32>
    %15 = vector.multi_reduction <add>, %14, %cst_5 [0] : vector<8x64xf32> to vector<64xf32>
    %16 = vector.shape_cast %15 : vector<64xf32> to vector<1x64xf32>
    %cst_6 = arith.constant 0.000000e+00 : f32
    %17 = vector.broadcast %cst_6 : f32 to vector<8x64xf32>
    %18 = arith.select %7, %13, %17 : vector<8x64xi1>, vector<8x64xf32>
    %cst_7 = arith.constant dense<0.000000e+00> : vector<64xf32>
    %19 = vector.multi_reduction <add>, %18, %cst_7 [0] : vector<8x64xf32> to vector<64xf32>
    %20 = vector.shape_cast %19 : vector<64xf32> to vector<1x64xf32>
    %21 = math.log %16 : vector<1x64xf32>
    %22 = arith.subf %21, %20 : vector<1x64xf32>
    %cst_8 = arith.constant 0.000000e+00 : f32
    %23 = vector.broadcast %cst_8 : f32 to vector<1x64xf32>
    %24 = arith.select %11, %22, %23 : vector<1x64xi1>, vector<1x64xf32>
    %c0_9 = arith.constant 0 : index
    %c0_10 = arith.constant 0 : index
    %c0_11 = arith.constant 0 : index
    %25 = vector.load %arg5[%c0_9, %c0_10, %c0_11] : memref<1x1x64xf32, #tpu.memory_space<vmem>>, vector<1x1x64xf32>
    %26 = vector.shape_cast %25 : vector<1x1x64xf32> to vector<1x64xf32>
    %27 = arith.mulf %24, %26 : vector<1x64xf32>
    %28 = vector.shape_cast %27 : vector<1x64xf32> to vector<1x1x64xf32>
    %cst_12 = arith.constant dense<0.000000e+00> : vector<1xf32>
    %29 = vector.multi_reduction <add>, %28, %cst_12 [1, 2] : vector<1x1x64xf32> to vector<1xf32>
    %30 = vector.shape_cast %29 : vector<1xf32> to vector<1x1x1xf32>
    %31 = vector.extract %30[0, 0, 0] : f32 from vector<1x1x1xf32>
    %32 = vector.broadcast %31 : f32 to vector<1x1xf32>
    %c0_13 = arith.constant 0 : index
    %c0_14 = arith.constant 0 : index
    %c0_15 = arith.constant 0 : index
    %33 = vector.load %arg6[%c0_13, %c0_14, %c0_15] : memref<1x1x1xf32, #tpu.memory_space<vmem>>, vector<1x1x1xf32>
    %34 = vector.shape_cast %33 : vector<1x1x1xf32> to vector<1x1xf32>
    %35 = vector.shape_cast %32 : vector<1x1xf32> to vector<1x1x1xf32>
    tpu.vector_store %arg6[%c0_13, %c0_14, %c0_15], %35 {strides = array<i32>} : memref<1x1x1xf32, #tpu.memory_space<vmem>>, vector<1x1x1xf32>,
    return
  }
  func.func @transform_0(%arg0: i32, %arg1: i32, %arg2: i32) -> (i32, i32, i32) {
    %c0_i32 = arith.constant 0 : i32
    return %arg0, %arg2, %arg1 : i32, i32, i32
  }
  func.func @transform_1(%arg0: i32, %arg1: i32, %arg2: i32) -> (i32, i32, i32) {
    %c0_i32 = arith.constant 0 : i32
    %c0_i32_0 = arith.constant 0 : i32
    return %arg0, %c0_i32, %arg1 : i32, i32, i32
  }
  func.func @transform_2(%arg0: i32, %arg1: i32, %arg2: i32) -> (i32, i32, i32) {
    %c0_i32 = arith.constant 0 : i32
    %c0_i32_0 = arith.constant 0 : i32
    return %arg0, %c0_i32, %arg1 : i32, i32, i32
  }
  func.func @transform_3(%arg0: i32, %arg1: i32, %arg2: i32) -> (i32, i32, i32) {
    %c1_i32 = arith.constant 1 : i32
    %0 = arith.muli %arg0, %c1_i32 : i32
    %1 = arith.addi %0, %arg1 : i32
    %c0_i32 = arith.constant 0 : i32
    %c0_i32_0 = arith.constant 0 : i32
    %c0_i32_1 = arith.constant 0 : i32
    return %1, %c0_i32, %c0_i32_0 : i32, i32, i32
  }
}

</mosaic_0001>

<bundles_post_ra>
// kernel: tpu_custom_call.1
= control target key start
LH: loop header
LB: loop body
LE: loop exit
PB: predicated region body
PF: predicated region fallthrough
CT: control target
= control target key end

     0   :  { %8 = vsyncpa [#allocation3], 0  ;;  %s729_s0 = inlined_call_operand.hbm [shape: f32[2,8,64], index: 0, kind: input, shape index: {}]   ;;  %s730_s1 = inlined_call_operand.vmem [shape: s32[2,1,64], index: 1, kind: input, shape index: {}]   ;;  %s731_s2 = inlined_call_operand.vmem [shape: f32[2,1,64], index: 2, kind: input, shape index: {}]   ;;  %s732_s3 = inlined_call_operand.vmem [shape: f32[2,1,1], index: 3, kind: output, shape index: {}]  }
   0x1   :  { %10 = vsyncpa [#allocation3 + $0x1], 0  ;;  %s590_s12 = smov 0   ;;  %s592_s13 = smov 0  }
   0x2   :  { %s594_s14 = smov 0   ;;  %s596_s15 = smov 0  }
   0x3   :  { %s598_s16 = smov 0   ;;  %s600_s17 = smov 0  }
   0x4 LB: > { %s416_s18 = sadd.s32 4294967295, %s567_s17   ;;  %s35_s19 = sadd.s32 1, %s563_s16  ;;  %s567_s17 = sphi %s600_s17, %s16_s17   ;;  %s563_s16 = sphi %s598_s16, %s742_s16   ;;  %s559_s15 = sphi %s596_s15, %s741_s15   ;;  %s555_s14 = sphi %s594_s14, %s740_s14   ;;  %s551_s13 = sphi %s592_s13, %s739_s13   ;;  %s547_s12 = sphi %s590_s12, %s738_s12  }
   0x5   : > { %p37_p0 = scmp.ge.s32.totalorder %s35_s19, 2  ;;  %s46_s20 = sadd.s32 1, %s555_s14 }
   0x6   : > { %p53_p1 = scmp.ne.s32.totalorder %s555_s14, %s551_s13  ;;  %p54_p2 = scmp.eq.s32.totalorder %s567_s17, 0 }
   0x7   : > { %s744_s19 = smov (%p37_p0, %s35_s19), 0  ;;  %p59_p4 = scmp.ne.s32.totalorder %s551_s13, %s547_s12 }
   0x8   : > { %p626_p3 = por %p54_p2, %p53_p1  ;;  %s39_s22 = ssub.s32 %s563_s16, %s744_s19 }
   0x9   : > { %p60_p5 = scmp.eq.s32.totalorder %s416_s18, 0  ;;  %p44_p6 = scmp.eq.s32.totalorder %s39_s22, 0 }
   0xa   : > { %p434_p8 = scmp.lt.s32.totalorder %s567_s17, 2  ;;  %s167_s25 = sand.u32 1, %s555_s14  }
   0xb   : > { %p633_p7 = por %p60_p5, %p59_p4  ;;  %s421_s26 = sshll.u32 %s563_s16, 7 }
   0xc   : > { %s639_s24 = scalar_select %p44_p6, %s555_s14, %s46_s20  }
   0xd   : > { %s420_s27 = sshll.u32 %s167_s25, 3  ;;  %s646_s30 = scalar_lea.hbm %s729_s0, %s421_s26 }
   0xe   : > { %s171_s4 = scalar_lea.vmem [#allocation2], %s420_s27  ;;  %p650_p9 = pnand %p434_p8, %p626_p3 }
   0xf   : > { %s180_s5 = sshll.u32 %s171_s4, 4  ;;  %s168_s7 = scalar_lea.sflag [#allocation3], %s167_s25  ;;  %s654_s5 = int_to_ptr.vmem [resolvable:$true] %s180_s5 }
  0x10   : > { %s487_s8 = scalar_lea.hbm %s646_s30, 128  ;;  %p489_p13 = pneg %p650_p9 }
  0x11   : > { %p488_p12 = scmp.ne.s32.totalorder %s646_s30, %s487_s8  ;;  %s492_s11 = scalar_lea.hbm %s729_s0, 256 }
  0x12   : > { %p493_p2 = scmp.lt.u32.totalorder %s646_s30, %s729_s0  ;;  %p494_p3 = scmp.lt.u32.totalorder %s492_s11, %s487_s8 }
  0x13   : > { %p490_p0 = pnand %p489_p13, %p488_p12  ;;  %p496_p5 = scmp.lt.u32.totalorder %s487_s8, %s646_s30 }
  0x14   : > { %p495_p4 = por %p494_p3, %p493_p2 }
  0x15   : > { %p491_p1 = pneg %p490_p0 }
  0x16   : > { %p497_p6 = por %p496_p5, %p495_p4 }
  0x18   : > { %p498_p8 = pnand %p497_p6, %p491_p1 }
  0x1a   : > { %501 = shalt.err (!%p498_p8)
}
  0x1b   : > { %s502_s20 = scalar_lea.vmem %s654_s5, 128  ;;  %s569_s21 = smov [#allocation2]  }
  0x1c   : > { %p503_p12 = scmp.ne.s32.totalorder %s654_s5, %s502_s20  ;;  %s507_s22 = sshll.u32 %s569_s21, 4  ;;  %s508_s22 = int_to_ptr.vmem [resolvable:$false] %s507_s22 }
  0x1d   : > { %s509_s25 = scalar_lea.vmem %s508_s22, 256  ;;  %p510_p11 = scmp.lt.s32.totalorder %s654_s5, %s508_s22 }
  0x1e   : > { %p505_p0 = pnand %p503_p12, %p489_p13  ;;  %p511_p2 = scmp.lt.s32.totalorder %s509_s25, %s502_s20 }
  0x20   : > { %p506_p10 = pneg %p505_p0  ;;  %p512_p3 = por %p511_p2, %p510_p11 }
  0x22   : > { %p513_p4 = pnand %p512_p3, %p506_p10 }
  0x24   : > { %516 = shalt.err (!%p513_p4)
}
  0x25   : > { %433 = dma.hbm_to_vmem [thread:$0]  (!%p650_p9), %s646_s30, 128, %s654_s5, %s168_s7  }
  0x26   : > { %p736_p1 = scmp.lt.s32.totalorder %s567_s17, 3  ;;  %p737_p5 = scmp.ge.s32.totalorder %s567_s17, 1 }
  0x28   : > { %p204_p13 = pnand %p737_p5, %p736_p1 }
  0x29   : > { %s209_s26 = sand.u32 (!%p204_p13), 1, %s551_s13  }
  0x2a   : > { %207 = sbr.rel (%p204_p13) target bundleno = 317 (0x13d), region = 32  ;;  %s423_s27 = sshll.u32 (!%p204_p13), %s209_s26, 3 }
  0x2b   : > { %s210_s28 = scalar_lea.sflag (!%p204_p13), [#allocation3], %s209_s26  ;;  %s213_s29 = scalar_lea.vmem (!%p204_p13), [#allocation2], %s423_s27 }
  0x31   : > { %542 = dma.done.wait (%p633_p7), %s210_s28, 128  }
  0x32   : > { %544 = vsyncadd (%p633_p7), %s210_s28, 4294967168  ;;  %vm273_vm0 = vcmask 523264   ;;  %v264_v0 = vld [vmem:[%s213_s29] sm:$0xff]  ;;  %p247_p9 = scmp.lt.s32.totalorder %s559_s15, 1  ;;  %v266_v4 = vlaneseq  ;;  %vm306_vm3 = vcmask 516096   ;;  %vm318_vm4 = vcmask 0  }
  0x33   : > { %v274_v1 = vsel %vm273_vm0, %v264_v0, -inf }
  0x34   : > { %v275_v2 = vrot.slane %v274_v1, 4  ;;  %s746_s15 = smov (!%p247_p9, %s559_s15), 1  ;;  %v267_v7 = vshrl.u32 %v266_v4, 7 }
  0x35   : > { %s252_s4 = scalar_lea.vmem %s730_s1, %s746_s15  ;;  %s258_s7 = scalar_lea.vmem %s731_s2, %s746_s15 }
  0x36   : > { %v276_v3 = vmax.f32 %v274_v1, %v275_v2  ;;  %v270_v10 = vsub.s32 0, %v267_v7  ;;  %v265_v12 = vld [vmem:[%s252_s4] sm:$0x1]  ;;  %s262_s10 = scalar_lea.vmem %s732_s3, %s746_s15 }
  0x37   : > { %vm281_vm2 = vcmp.ne.s32.totalorder %v265_v12, 4294967196  ;;  %v304_v34 = vld [vmem:[%s258_s7] sm:$0x1] }
  0x38   : > { %v277_v5 = vrot.slane %v276_v3, 2  ;;  %v271_v14 = vrot.slane %v265_v12, %v270_v10 }
  0x3a   : > { %v278_v6 = vmax.f32 %v276_v3, %v277_v5  ;;  %vm272_vm1 = vcmp.eq.s32.totalorder %v267_v7, %v271_v14 }
  0x3c   : > { %v279_v8 = vrot.slane %v278_v6, 1 }
  0x3e   : > { %v280_v9 = vmax.f32 %v278_v6, %v279_v8 }
  0x40   : > { %v282_v11 = vsub.f32 %v264_v0, %v280_v9 }
  0x42   : > { %v283_v13 = vmul.f32 1.442695, %v282_v11  ;;  %v292_v15 = vsel %vm272_vm1, %v282_v11, 0.0 }
  0x43   : > { %v293_v17 = vsel %vm273_vm0, %v292_v15, 0.0 }
  0x44   : > { %483 = vpow2.f32 %v283_v13  ;;  %v294_v20 = vrot.slane %v293_v17, 4 }
  0x46   : > { %v295_v23 = vadd.f32 %v294_v20, %v293_v17 }
  0x48   : > { %v296_v26 = vrot.slane %v295_v23, 2 }
  0x4a   : > { %v297_v28 = vadd.f32 %v296_v26, %v295_v23 }
  0x4c   : > { %v298_v29 = vrot.slane %v297_v28, 1 }
  0x4e   : > { %v484_v16 = vpop.eup %483  ;;  %v299_v30 = vadd.f32 %v298_v29, %v297_v28 }
  0x4f   : > { %v285_v18 = vsel %vm273_vm0, %v484_v16, 0.0 }
  0x50   : > { %v286_v19 = vrot.slane %v285_v18, 4 }
  0x52   : > { %v287_v21 = vadd.f32 %v286_v19, %v285_v18 }
  0x54   : > { %v288_v22 = vrot.slane %v287_v21, 2 }
  0x56   : > { %v289_v24 = vadd.f32 %v288_v22, %v287_v21 }
  0x58   : > { %v290_v25 = vrot.slane %v289_v24, 1 }
  0x5a   : > { %v291_v27 = vadd.f32 %v290_v25, %v289_v24 }
  0x5c   : > { %485 = vlog2.f32 %v291_v27 }
  0x66   : > { %v486_v31 = vpop.eup %485 }
  0x67   : > { %v301_v32 = vmul.f32 0.6931472, %v486_v31 }
  0x69   : > { %v302_v33 = vsub.f32 %v301_v32, %v299_v30 }
  0x6b   : > { %v303_v35 = vsel %vm281_vm2, %v302_v33, 0.0 }
  0x6c   : > { %v305_v36 = vmul.f32 %v304_v34, %v303_v35 }
  0x6e   : > { %v307_v37 = vsel %vm306_vm3, %v305_v36, 0.0 }
  0x6f   : > { %308 = vadd.xlane.f32.xlu0 %v307_v37 }
  0xfc   : > { %v309_v38 = vpop.xlane.xlu0 %308 }
  0xfd   : > { %v310_v39 = vrot.slane %v309_v38, 4 }
  0xff   : > { %v311_v40 = vadd.f32 %v310_v39, %v309_v38 }
 0x101   : > { %v312_v41 = vrot.slane %v311_v40, 2 }
 0x103   : > { %v313_v42 = vadd.f32 %v312_v41, %v311_v40 }
 0x105   : > { %v314_v43 = vrot.slane %v313_v42, 1 }
 0x107   : > { %v315_v44 = vadd.f32 %v314_v43, %v313_v42 }
 0x109   : > { %426 = vpush %v315_v44 }
 0x13a   : > { %s427_s11 = spop %426 }
 0x13b   : > { %v317_v45 = vstv %s427_s11 }
 0x13c   : > { %319 = vst.msk [vmem:[%s262_s10] sm:$0x1] %vm318_vm4, %v317_v45 }
 0x13d PF: > { %s16_s17 = sadd.s32 1, %s567_s17   ;;  %s738_s12 = smov %s551_s13 }
 0x13e   : > { %p13_p7 = scmp.ge.s32.totalorder %s16_s17, 4   ;;  %s739_s13 = smov %s555_s14 }
 0x13f   : > { %s740_s14 = smov %s639_s24  ;;  %s741_s15 = smov %s563_s16 }
 0x140   : > { %s742_s16 = smov %s744_s19  ;;  %15 = sbr.rel (!%p13_p7) target bundleno = 4 (0x4), region = 78 }
 0x147   :  { %340 = vsyncpa [#allocation3], 1 }
 0x148   :  { %342 = vsyncpa [#allocation3 + $0x1], 1 }

</bundles_post_ra>
